<compile_context>
chip_gen: v7x
topology: tpu7x:2x2x1
jax: 0.10.0
libtpu: 0.0.40
codegen_flags: <defaults>
</compile_context>

<pallas_src>
import functools

import jax
import jax.numpy as jnp
from jax.experimental import pallas as pl
from jax.experimental.pallas import tpu as pltpu

_LANE = 128
_SUBLANE = 8
_F32 = 4


def fm_kernel(x_ref, vaug_ref, vsq_ref, b_ref, o_ref, *, latent_dim):
    x = x_ref[...]                       # (tb, D)   float32
    v_aug = vaug_ref[...]                # (D, K+1)  [:, :K] = v, [:, K] = linear weight
    vsq = vsq_ref[...]                   # (1, D)    sum_k v[:, k]**2 per feature
    b = b_ref[0, 0]                      # scalar bias from SMEM

    # Single MXU matmul: columns 0..K-1 are (x @ v), column K is (x @ W^T).
    s_aug = jnp.dot(x, v_aug, preferred_element_type=jnp.float32)    # (tb, K+1)
    s = s_aug[:, :latent_dim]                                        # (tb, K)
    linear = s_aug[:, latent_dim:latent_dim + 1] + b                 # (tb, 1)

    # sum_k (x @ v)_k^2
    square_of_sum = jnp.sum(s * s, axis=1, keepdims=True)            # (tb, 1)
    # sum_k ((x^2) @ (v^2))_k == (x^2) . sum_k(v^2)  (VPU mul + XLU lane reduce)
    sum_of_square = jnp.sum((x * x) * vsq, axis=1, keepdims=True)    # (tb, 1)

    out = linear + 0.5 * (square_of_sum - sum_of_square)
    o_ref[...] = out.astype(o_ref.dtype)


def _round_up(n, m):
    return ((n + m - 1) // m) * m


def _padded_bytes(rows, cols):
    """VMEM footprint of an f32 (rows, cols) buffer after (8, 128) tiling."""
    return _round_up(max(rows, 1), _SUBLANE) * _round_up(max(cols, 1), _LANE) * _F32


def _hw_info():
    """Best-effort (vmem_capacity_bytes, num_tensorcores). Conservative fallbacks:
    64 MiB VMEM (valid across v5e/v6e/v7x) and a single TensorCore."""
    vmem_capacity = 64 * 1024 * 1024
    num_cores = 1
    try:
        info = pltpu.get_tpu_info()
        cap = getattr(info, "vmem_capacity_bytes", None)
        if cap:
            vmem_capacity = int(cap)
        for attr in ("num_cores", "num_tensorcores", "core_count"):
            val = getattr(info, attr, None)
            if val:
                num_cores = int(val)
                break
    except Exception:
        pass
    if num_cores == 1:
        try:
            kind = jax.devices()[0].device_kind.lower()
            if "v7" in kind:
                num_cores = 2   # v7x: two TensorCores can share the parallel grid axis
        except Exception:
            pass
    return vmem_capacity, num_cores


def _choose_tile_rows(B, D, vmem_budget, num_cores):
    """Largest batch tile (multiple of 8) such that the double-buffered x tile
    plus the lane-padded double-buffered (tb, 1) output tile fit the budget,
    soft-capped at a 16 MiB x tile (HBM roofline plateau is reached well below)."""
    d_pad = _round_up(D, _LANE)
    x_bytes_per_row = _F32 * d_pad
    per_row = 2 * x_bytes_per_row + 2 * _F32 * _LANE   # x + output, both 2-deep

    rows_by_vmem = max(vmem_budget // per_row, _SUBLANE)
    rows_cap = max((16 * 1024 * 1024) // x_bytes_per_row, _SUBLANE)
    tb = min(B, rows_by_vmem, rows_cap)

    # Multi-core split: keep >= num_cores parallel grid steps, but only if each
    # split tile still moves >= ~2 MiB of x (amortizes ~0.35 us per-step cost).
    if num_cores > 1:
        split_rows = pl.cdiv(B, num_cores)
        if split_rows * x_bytes_per_row >= 2 * 1024 * 1024:
            tb = min(tb, split_rows)

    if tb >= _SUBLANE:
        tb = (tb // _SUBLANE) * _SUBLANE
    else:
        tb = B                              # tiny batch: one full-extent block
    return max(int(tb), 1)


def _vmem_limit_bytes(tb, D, K, resident_copies, vmem_capacity):
    x_bufs = 2 * _padded_bytes(tb, D)                      # double-buffered x tile
    out_bufs = 2 * _padded_bytes(tb, 1)                    # double-buffered output tile
    residents = resident_copies * (_padded_bytes(D, K + 1) + _padded_bytes(1, D))
    est = x_bufs + out_bufs + residents
    est = int(est * 1.25) + (2 << 20)                      # compiler-scratch headroom
    cap = int(0.9 * vmem_capacity)
    return max(min(est, cap), 4 << 20)


def factorization_machine(x, v, w_col, bias, *, tb=None):
    """x: (B, D), v: (D, K), w_col: (D, 1), bias: (1, 1) -> (B, 1)."""
    B, D = x.shape
    K = v.shape[1]

    # Precompute (once, in XLA) the augmented factor matrix and the K-reduced
    # squared factors; both are tiny relative to x.
    v_aug = jnp.concatenate([v, w_col], axis=1).astype(jnp.float32)       # (D, K+1)
    vsq_row = jnp.sum(v * v, axis=1).reshape(1, D).astype(jnp.float32)    # (1, D)
    x = x.astype(jnp.float32)
    bias = jnp.asarray(bias, dtype=jnp.float32).reshape(1, 1)

    vmem_capacity, num_cores = _hw_info()
    vmem_budget = int(0.70 * vmem_capacity)   # leave headroom for compiler scratch
    if tb is None:
        tb = _choose_tile_rows(B, D, vmem_budget, num_cores)
    tb = max(min(int(tb), B), 1)

    grid = (pl.cdiv(B, tb),)
    kernel = functools.partial(fm_kernel, latent_dim=K)

    def build(single_buffer_residents):
        resident_kwargs = {}
        if single_buffer_residents:
            # Grid-invariant residents: a single VMEM copy is enough.
            resident_kwargs = {"pipeline_mode": pl.Buffered(1)}
        in_specs = [
            pl.BlockSpec((tb, D), lambda i: (i, 0)),                     # x row tile
            pl.BlockSpec((D, K + 1), lambda i: (0, 0), **resident_kwargs),
            pl.BlockSpec((1, D), lambda i: (0, 0), **resident_kwargs),
            pl.BlockSpec(memory_space=pltpu.MemorySpace.SMEM),           # bias scalar
        ]
        resident_copies = 1 if single_buffer_residents else 2
        return pl.pallas_call(
            kernel,
            out_shape=jax.ShapeDtypeStruct((B, 1), jnp.float32),
            grid_spec=pltpu.PrefetchScalarGridSpec(
                num_scalar_prefetch=0,
                grid=grid,
                in_specs=in_specs,
                out_specs=pl.BlockSpec((tb, 1), lambda i: (i, 0)),
            ),
            compiler_params=pltpu.CompilerParams(
                dimension_semantics=("parallel",),
                vmem_limit_bytes=_vmem_limit_bytes(
                    tb, D, K, resident_copies, vmem_capacity),
            ),
        )

    use_single_buffer = hasattr(pl, "Buffered")
    try:
        return build(use_single_buffer)(x, v_aug, vsq_row, bias)
    except Exception:
        if not use_single_buffer:
            raise
        # Fallback: this runtime rejected Buffered(1) residents; use defaults.
        return build(False)(x, v_aug, vsq_row, bias)


def fm_reference(x, v, w_col, bias):
    linear = x @ w_col + bias[0, 0]
    square_of_sum = (x @ v) ** 2
    sum_of_square = (x ** 2) @ (v ** 2)
    pair = jnp.sum(square_of_sum - sum_of_square, axis=1, keepdims=True)
    return linear + 0.5 * pair


if __name__ == "__main__":
    # Case 1: small shapes consistent with FactorizationMachine(input_dim=32,
    # latent_dim=16); parameters match the module's __init__ shapes
    # (v ~ torch.rand(D, K); linear weight stored as a (D, 1) column; bias (1, 1)).
    key = jax.random.PRNGKey(0)
    kx, kv, kw, kb = jax.random.split(key, 4)
    B, input_dim, latent_dim = 8, 32, 16
    x = jax.random.normal(kx, (B, input_dim), dtype=jnp.float32)
    v = jax.random.uniform(kv, (input_dim, latent_dim), dtype=jnp.float32)
    w_col = jax.random.normal(kw, (input_dim, 1), dtype=jnp.float32) * 0.1
    bias = jax.random.normal(kb, (1, 1), dtype=jnp.float32) * 0.1

    out = jax.block_until_ready(factorization_machine(x, v, w_col, bias))
    ref = fm_reference(x, v, w_col, bias)
    assert out.shape == (B, 1)
    assert jnp.allclose(out, ref, atol=1e-4, rtol=1e-4), (out, ref)

    # Case 2: multi-tile grid with a partial last tile (B % tb != 0) to
    # exercise output masking on the ragged edge.
    key2 = jax.random.fold_in(key, 1)
    k2x, k2v, k2w, k2b = jax.random.split(key2, 4)
    B2, D2, K2 = 200, 96, 24
    x2 = jax.random.normal(k2x, (B2, D2), dtype=jnp.float32)
    v2 = jax.random.uniform(k2v, (D2, K2), dtype=jnp.float32)
    w2 = jax.random.normal(k2w, (D2, 1), dtype=jnp.float32) * 0.1
    b2 = jax.random.normal(k2b, (1, 1), dtype=jnp.float32) * 0.1

    out2 = jax.block_until_ready(factorization_machine(x2, v2, w2, b2, tb=64))
    ref2 = fm_reference(x2, v2, w2, b2)
    assert out2.shape == (B2, 1)
    assert jnp.allclose(out2, ref2, atol=1e-2, rtol=1e-4), (out2, ref2)

    print("KERNEL_OK")
</pallas_src>

<mosaic_0001>
module attributes {stable_mosaic.version = 11 : i64} {
  func.func @fm_kernel(%arg0: i32, %arg1: memref<8x32xf32, #tpu.memory_space<vmem>>, %arg2: memref<32x17xf32, #tpu.memory_space<vmem>>, %arg3: memref<1x32xf32, #tpu.memory_space<vmem>>, %arg4: memref<1x1xf32, #tpu.memory_space<smem>>, %arg5: memref<8x1xf32, #tpu.memory_space<vmem>>) attributes {dimension_semantics = [#tpu.dimension_semantics<parallel>], iteration_bounds = array<i64: 1>, scalar_prefetch = 0 : i64, scratch_operands = 0 : i64, tpu.core_type = #tpu.core_type<tc>, window_params = [{transform_indices = @transform_0, window_bounds = array<i64: 8, 32>}, {pipeline_mode = #tpu.pipeline_mode<synchronous>, transform_indices = @transform_1, window_bounds = array<i64: 32, 17>}, {pipeline_mode = #tpu.pipeline_mode<synchronous>, transform_indices = @transform_2, window_bounds = array<i64: 1, 32>}, {transform_indices = @transform_3, window_bounds = array<i64: 1, 1>}, {transform_indices = @transform_4, window_bounds = array<i64: 8, 1>}]} {
    %c0 = arith.constant 0 : index
    %c0_0 = arith.constant 0 : index
    %0 = vector.load %arg1[%c0, %c0_0] : memref<8x32xf32, #tpu.memory_space<vmem>>, vector<8x32xf32>
    %c0_1 = arith.constant 0 : index
    %c0_2 = arith.constant 0 : index
    %1 = vector.load %arg2[%c0_1, %c0_2] : memref<32x17xf32, #tpu.memory_space<vmem>>, vector<32x17xf32>
    %c0_3 = arith.constant 0 : index
    %c0_4 = arith.constant 0 : index
    %2 = vector.load %arg3[%c0_3, %c0_4] : memref<1x32xf32, #tpu.memory_space<vmem>>, vector<1x32xf32>
    %c0_5 = arith.constant 0 : index
    %c0_6 = arith.constant 0 : index
    %3 = memref.load %arg4[%c0_5, %c0_6] : memref<1x1xf32, #tpu.memory_space<smem>>
    %cst = arith.constant dense<0.000000e+00> : vector<8x17xf32>
    %4 = tpu.matmul %0, %1, %cst {dimension_numbers = #tpu.dot_dimension_numbers<[1], [0], [0], [1], [0, 0, 1, 1], [], []>} : vector<8x32xf32>, vector<32x17xf32>, vector<8x17xf32> -> vector<8x17xf32>
    %5 = vector.extract_strided_slice %4 {offsets = [0, 0], sizes = [8, 16], strides = [1, 1]} : vector<8x17xf32> to vector<8x16xf32>
    %6 = vector.extract_strided_slice %4 {offsets = [0, 16], sizes = [8, 1], strides = [1, 1]} : vector<8x17xf32> to vector<8x1xf32>
    %7 = vector.broadcast %3 : f32 to vector<8x1xf32>
    %8 = arith.addf %6, %7 : vector<8x1xf32>
    %9 = arith.mulf %5, %5 : vector<8x16xf32>
    %cst_7 = arith.constant dense<0.000000e+00> : vector<8xf32>
    %10 = vector.multi_reduction <add>, %9, %cst_7 [1] : vector<8x16xf32> to vector<8xf32>
    %11 = vector.shape_cast %10 : vector<8xf32> to vector<8x1xf32>
    %12 = arith.mulf %0, %0 : vector<8x32xf32>
    %13 = vector.broadcast %2 : vector<1x32xf32> to vector<8x32xf32>
    %14 = arith.mulf %12, %13 : vector<8x32xf32>
    %cst_8 = arith.constant dense<0.000000e+00> : vector<8xf32>
    %15 = vector.multi_reduction <add>, %14, %cst_8 [1] : vector<8x32xf32> to vector<8xf32>
    %16 = vector.shape_cast %15 : vector<8xf32> to vector<8x1xf32>
    %17 = arith.subf %11, %16 : vector<8x1xf32>
    %cst_9 = arith.constant 5.000000e-01 : f32
    %18 = vector.broadcast %cst_9 : f32 to vector<8x1xf32>
    %19 = arith.mulf %18, %17 : vector<8x1xf32>
    %20 = arith.addf %8, %19 : vector<8x1xf32>
    %c0_10 = arith.constant 0 : index
    %c0_11 = arith.constant 0 : index
    %21 = vector.load %arg5[%c0_10, %c0_11] : memref<8x1xf32, #tpu.memory_space<vmem>>, vector<8x1xf32>
    tpu.vector_store %arg5[%c0_10, %c0_11], %20 {strides = array<i32>} : memref<8x1xf32, #tpu.memory_space<vmem>>, vector<8x1xf32>,
    return
  }
  func.func @transform_0(%arg0: i32) -> (i32, i32) {
    %c0_i32 = arith.constant 0 : i32
    %c0_i32_0 = arith.constant 0 : i32
    return %arg0, %c0_i32 : i32, i32
  }
  func.func @transform_1(%arg0: i32) -> (i32, i32) {
    %c0_i32 = arith.constant 0 : i32
    %c0_i32_0 = arith.constant 0 : i32
    %c0_i32_1 = arith.constant 0 : i32
    return %c0_i32, %c0_i32_0 : i32, i32
  }
  func.func @transform_2(%arg0: i32) -> (i32, i32) {
    %c0_i32 = arith.constant 0 : i32
    %c0_i32_0 = arith.constant 0 : i32
    %c0_i32_1 = arith.constant 0 : i32
    return %c0_i32, %c0_i32_0 : i32, i32
  }
  func.func @transform_3(%arg0: i32) -> (i32, i32) {
    %c0_i32 = arith.constant 0 : i32
    %c0_i32_0 = arith.constant 0 : i32
    %c0_i32_1 = arith.constant 0 : i32
    return %c0_i32, %c0_i32_0 : i32, i32
  }
  func.func @transform_4(%arg0: i32) -> (i32, i32) {
    %c0_i32 = arith.constant 0 : i32
    %c0_i32_0 = arith.constant 0 : i32
    return %arg0, %c0_i32 : i32, i32
  }
}

module attributes {stable_mosaic.version = 11 : i64} {
  func.func @fm_kernel(%arg0: i32, %arg1: memref<8x32xf32, #tpu.memory_space<vmem>>, %arg2: memref<32x17xf32, #tpu.memory_space<vmem>>, %arg3: memref<1x32xf32, #tpu.memory_space<vmem>>, %arg4: memref<1x1xf32, #tpu.memory_space<smem>>, %arg5: memref<8x1xf32, #tpu.memory_space<vmem>>) attributes {dimension_semantics = [#tpu.dimension_semantics<parallel>], iteration_bounds = array<i64: 1>, scalar_prefetch = 0 : i64, scratch_operands = 0 : i64, tpu.core_type = #tpu.core_type<tc>, window_params = [{transform_indices = @transform_0, window_bounds = array<i64: 8, 32>}, {pipeline_mode = #tpu.pipeline_mode<synchronous>, transform_indices = @transform_1, window_bounds = array<i64: 32, 17>}, {pipeline_mode = #tpu.pipeline_mode<synchronous>, transform_indices = @transform_2, window_bounds = array<i64: 1, 32>}, {transform_indices = @transform_3, window_bounds = array<i64: 1, 1>}, {transform_indices = @transform_4, window_bounds = array<i64: 8, 1>}]} {
    %c0 = arith.constant 0 : index
    %c0_0 = arith.constant 0 : index
    %0 = vector.load %arg1[%c0, %c0_0] : memref<8x32xf32, #tpu.memory_space<vmem>>, vector<8x32xf32>
    %c0_1 = arith.constant 0 : index
    %c0_2 = arith.constant 0 : index
    %1 = vector.load %arg2[%c0_1, %c0_2] : memref<32x17xf32, #tpu.memory_space<vmem>>, vector<32x17xf32>
    %c0_3 = arith.constant 0 : index
    %c0_4 = arith.constant 0 : index
    %2 = vector.load %arg3[%c0_3, %c0_4] : memref<1x32xf32, #tpu.memory_space<vmem>>, vector<1x32xf32>
    %c0_5 = arith.constant 0 : index
    %c0_6 = arith.constant 0 : index
    %3 = memref.load %arg4[%c0_5, %c0_6] : memref<1x1xf32, #tpu.memory_space<smem>>
    %cst = arith.constant dense<0.000000e+00> : vector<8x17xf32>
    %4 = tpu.matmul %0, %1, %cst {dimension_numbers = #tpu.dot_dimension_numbers<[1], [0], [0], [1], [0, 0, 1, 1], [], []>} : vector<8x32xf32>, vector<32x17xf32>, vector<8x17xf32> -> vector<8x17xf32>
    %5 = vector.extract_strided_slice %4 {offsets = [0, 0], sizes = [8, 16], strides = [1, 1]} : vector<8x17xf32> to vector<8x16xf32>
    %6 = vector.extract_strided_slice %4 {offsets = [0, 16], sizes = [8, 1], strides = [1, 1]} : vector<8x17xf32> to vector<8x1xf32>
    %7 = vector.broadcast %3 : f32 to vector<8x1xf32>
    %8 = arith.addf %6, %7 : vector<8x1xf32>
    %9 = arith.mulf %5, %5 : vector<8x16xf32>
    %cst_7 = arith.constant dense<0.000000e+00> : vector<8xf32>
    %10 = vector.multi_reduction <add>, %9, %cst_7 [1] : vector<8x16xf32> to vector<8xf32>
    %11 = vector.shape_cast %10 : vector<8xf32> to vector<8x1xf32>
    %12 = arith.mulf %0, %0 : vector<8x32xf32>
    %13 = vector.broadcast %2 : vector<1x32xf32> to vector<8x32xf32>
    %14 = arith.mulf %12, %13 : vector<8x32xf32>
    %cst_8 = arith.constant dense<0.000000e+00> : vector<8xf32>
    %15 = vector.multi_reduction <add>, %14, %cst_8 [1] : vector<8x32xf32> to vector<8xf32>
    %16 = vector.shape_cast %15 : vector<8xf32> to vector<8x1xf32>
    %17 = arith.subf %11, %16 : vector<8x1xf32>
    %cst_9 = arith.constant 5.000000e-01 : f32
    %18 = vector.broadcast %cst_9 : f32 to vector<8x1xf32>
    %19 = arith.mulf %18, %17 : vector<8x1xf32>
    %20 = arith.addf %8, %19 : vector<8x1xf32>
    %c0_10 = arith.constant 0 : index
    %c0_11 = arith.constant 0 : index
    %21 = vector.load %arg5[%c0_10, %c0_11] : memref<8x1xf32, #tpu.memory_space<vmem>>, vector<8x1xf32>
    tpu.vector_store %arg5[%c0_10, %c0_11], %20 {strides = array<i32>} : memref<8x1xf32, #tpu.memory_space<vmem>>, vector<8x1xf32>,
    return
  }
  func.func @transform_0(%arg0: i32) -> (i32, i32) {
    %c0_i32 = arith.constant 0 : i32
    %c0_i32_0 = arith.constant 0 : i32
    return %arg0, %c0_i32 : i32, i32
  }
  func.func @transform_1(%arg0: i32) -> (i32, i32) {
    %c0_i32 = arith.constant 0 : i32
    %c0_i32_0 = arith.constant 0 : i32
    %c0_i32_1 = arith.constant 0 : i32
    return %c0_i32, %c0_i32_0 : i32, i32
  }
  func.func @transform_2(%arg0: i32) -> (i32, i32) {
    %c0_i32 = arith.constant 0 : i32
    %c0_i32_0 = arith.constant 0 : i32
    %c0_i32_1 = arith.constant 0 : i32
    return %c0_i32, %c0_i32_0 : i32, i32
  }
  func.func @transform_3(%arg0: i32) -> (i32, i32) {
    %c0_i32 = arith.constant 0 : i32
    %c0_i32_0 = arith.constant 0 : i32
    %c0_i32_1 = arith.constant 0 : i32
    return %c0_i32, %c0_i32_0 : i32, i32
  }
  func.func @transform_4(%arg0: i32) -> (i32, i32) {
    %c0_i32 = arith.constant 0 : i32
    %c0_i32_0 = arith.constant 0 : i32
    return %arg0, %c0_i32 : i32, i32
  }
}

</mosaic_0001>

<bundles_post_ra>
// kernel: tpu_custom_call.1
= control target key start
LH: loop header
LB: loop body
LE: loop exit
PB: predicated region body
PF: predicated region fallthrough
CT: control target
= control target key end

     0   :  { %v158_v0 = vmov 0.0|0.0   ;;  %vm159_vm0 = vmmov 0   ;;  %v160_v4 = vmov 0.0   ;;  %vm25_vm1 = vcmask 261120   ;;  %s211_s1 = inlined_call_operand.vmem [shape: f32[32,17], index: 1, kind: input, shape index: {}]   ;;  %s212_s0 = inlined_call_operand.vmem [shape: f32[8,32], index: 0, kind: input, shape index: {}]   ;;  %s213_s2 = inlined_call_operand.vmem [shape: f32[1,32], index: 2, kind: input, shape index: {}]   ;;  %s214_s3 = inlined_call_operand.<no memory space> [shape: f32[1,1], index: 3, kind: input, shape index: {}]   ;;  %s215_s4 = inlined_call_operand.vmem [shape: f32[8,1], index: 4, kind: output, shape index: {}]  }
   0x1   :  { %148 = vmatprep.subr.bf16.mxu0 %v158_v0  ;;  %v19_v1 = vld [vmem:[%s211_s1] sm:$0xff]  ;;  %v20_v2 = vld [vmem:[%s211_s1 + $0x8] sm:$0xff]  ;;  %v21_v3 = vld [vmem:[%s211_s1 + $0x10] sm:$0xff]  ;;  %145 = vmatprep.mubr.msk.f32.mxu0 %vm159_vm0, %v160_v4  ;;  %vm102_vm2 = vcmask 130048   ;;  %v99_v18 = vstv %s214_s3  ;;  %vm124_vm3 = vcmask 7168  }
   0x2   :  { %v149_v5 = vpack.c.bf16 %v20_v2, %v19_v1  ;;  %v22_v6 = vld [vmem:[%s211_s1 + $0x18] sm:$0xff]  ;;  %v18_v8 = vld [vmem:[%s212_s0] sm:$0xff]  ;;  %s161_s0 = smov 112  }
   0x3   :  { %v152_v7 = vpack.c.bf16 %v22_v6, %v21_v3  ;;  %v106_v9 = vmul.f32 %v18_v8, %v18_v8  ;;  %v131_v10 = vld [vmem:[%s213_s2] ss:$0 sm:$0xff] }
   0x4   :  { %150 = vmatpush3.bf16.msra.mxu0 %v149_v5 }
   0x5   :  { %151 = vmatprep.subr.bf16.mxu0 %v158_v0  ;;  %v113_v14 = vmul.f32 %v131_v10, %v106_v9 }
   0x7   :  { %v114_v16 = vsel %vm25_vm1, %v113_v14, 0.0 }
   0x8   :  { %153 = vmatpush3.bf16.msra.mxu0 %v152_v7 }
   0xb   :  { %146 = vmatmul.mubr.msk.f32.vlgmr.msra.gmra.mrb[0].mxu0 %vm25_vm1, %v18_v8 }
  0xde   :  { %v95_v11 = vpop.f32.mrb[0].mxu0 }
  0xdf   :  { %v147_v12 = vpop.f32.mrb[1].mxu0  ;;  %v101_v13 = vmul.f32 %v95_v11, %v95_v11  ;;  %v100_v21 = vadd.f32 %v99_v18, %v95_v11 }
  0xe1   :  { %v103_v15 = vsel %vm102_vm2, %v101_v13, 0.0 }
  0xe2   :  { %104 = vadd.xlane.f32.xlu0 %v103_v15 }
  0xe6   :  { %115 = vadd.xlane.f32.xlu0 %v114_v16 }
 0x16f   :  { %v105_v17 = vpop.xlane.xlu0 %104 }
 0x173   :  { %v116_v19 = vpop.xlane.xlu0 %115 }
 0x174   :  { %v117_v20 = vsub.f32 %v105_v17, %v116_v19 }
 0x176   :  { %v118_v22 = vmul.f32 0.5, %v117_v20 }
 0x178   :  { %v119_v23 = vadd.f32 %v118_v22, %v100_v21 }
 0x17a   :  { %121 = vrot.lane.b32.xlu1 %v119_v23, %s161_s0 }
 0x1ec   :  { %v122_v24 = vpop.permute.xlu1 %121 }
 0x1ed   :  { %125 = vst.msk [vmem:[%s215_s4] sm:$0xff] %vm124_vm3, %v122_v24 }

// kernel: tpu_custom_call.1
= control target key start
LH: loop header
LB: loop body
LE: loop exit
PB: predicated region body
PF: predicated region fallthrough
CT: control target
= control target key end

     0   :  { %v158_v0 = vmov 0.0|0.0   ;;  %vm159_vm0 = vmmov 0   ;;  %v160_v4 = vmov 0.0   ;;  %vm25_vm1 = vcmask 261120   ;;  %s211_s1 = inlined_call_operand.vmem [shape: f32[32,17], index: 1, kind: input, shape index: {}]   ;;  %s212_s0 = inlined_call_operand.vmem [shape: f32[8,32], index: 0, kind: input, shape index: {}]   ;;  %s213_s2 = inlined_call_operand.vmem [shape: f32[1,32], index: 2, kind: input, shape index: {}]   ;;  %s214_s3 = inlined_call_operand.<no memory space> [shape: f32[1,1], index: 3, kind: input, shape index: {}]   ;;  %s215_s4 = inlined_call_operand.vmem [shape: f32[8,1], index: 4, kind: output, shape index: {}]  }
   0x1   :  { %148 = vmatprep.subr.bf16.mxu0 %v158_v0  ;;  %v19_v1 = vld [vmem:[%s211_s1] sm:$0xff]  ;;  %v20_v2 = vld [vmem:[%s211_s1 + $0x8] sm:$0xff]  ;;  %v21_v3 = vld [vmem:[%s211_s1 + $0x10] sm:$0xff]  ;;  %145 = vmatprep.mubr.msk.f32.mxu0 %vm159_vm0, %v160_v4  ;;  %vm102_vm2 = vcmask 130048   ;;  %v99_v18 = vstv %s214_s3  ;;  %vm124_vm3 = vcmask 7168  }
   0x2   :  { %v149_v5 = vpack.c.bf16 %v20_v2, %v19_v1  ;;  %v22_v6 = vld [vmem:[%s211_s1 + $0x18] sm:$0xff]  ;;  %v18_v8 = vld [vmem:[%s212_s0] sm:$0xff]  ;;  %s161_s0 = smov 112  }
   0x3   :  { %v152_v7 = vpack.c.bf16 %v22_v6, %v21_v3  ;;  %v106_v9 = vmul.f32 %v18_v8, %v18_v8  ;;  %v131_v10 = vld [vmem:[%s213_s2] ss:$0 sm:$0xff] }
   0x4   :  { %150 = vmatpush3.bf16.msra.mxu0 %v149_v5 }
   0x5   :  { %151 = vmatprep.subr.bf16.mxu0 %v158_v0  ;;  %v113_v14 = vmul.f32 %v131_v10, %v106_v9 }
   0x7   :  { %v114_v16 = vsel %vm25_vm1, %v113_v14, 0.0 }
   0x8   :  { %153 = vmatpush3.bf16.msra.mxu0 %v152_v7 }
   0xb   :  { %146 = vmatmul.mubr.msk.f32.vlgmr.msra.gmra.mrb[0].mxu0 %vm25_vm1, %v18_v8 }
  0xde   :  { %v95_v11 = vpop.f32.mrb[0].mxu0 }
  0xdf   :  { %v147_v12 = vpop.f32.mrb[1].mxu0  ;;  %v101_v13 = vmul.f32 %v95_v11, %v95_v11  ;;  %v100_v21 = vadd.f32 %v99_v18, %v95_v11 }
  0xe1   :  { %v103_v15 = vsel %vm102_vm2, %v101_v13, 0.0 }
  0xe2   :  { %104 = vadd.xlane.f32.xlu0 %v103_v15 }
  0xe6   :  { %115 = vadd.xlane.f32.xlu0 %v114_v16 }
 0x16f   :  { %v105_v17 = vpop.xlane.xlu0 %104 }
 0x173   :  { %v116_v19 = vpop.xlane.xlu0 %115 }
 0x174   :  { %v117_v20 = vsub.f32 %v105_v17, %v116_v19 }
 0x176   :  { %v118_v22 = vmul.f32 0.5, %v117_v20 }
 0x178   :  { %v119_v23 = vadd.f32 %v118_v22, %v100_v21 }
 0x17a   :  { %121 = vrot.lane.b32.xlu1 %v119_v23, %s161_s0 }
 0x1ec   :  { %v122_v24 = vpop.permute.xlu1 %121 }
 0x1ed   :  { %125 = vst.msk [vmem:[%s215_s4] sm:$0xff] %vm124_vm3, %v122_v24 }

</bundles_post_ra>
